<compile_context>
chip_gen: v7x
topology: tpu7x:2x2x1
jax: 0.10.0
libtpu: 0.0.40
codegen_flags: <defaults>
</compile_context>

<pallas_src>
import functools

import jax
import jax.numpy as jnp
from jax.experimental import pallas as pl
from jax.experimental.pallas import tpu as pltpu


# Budget for one grid step's VMEM footprint (double-buffered tiles + weight +
# accumulator). Conservative enough for v7x's 64 MiB VMEM / default scoped
# limits on all generations.
_TILE_VMEM_BUDGET = 16 * 1024 * 1024


# ------------------------- Pallas kernel -------------------------

def _conv1x1_kernel(b_tile, w_ref, x_ref, o_ref, acc_ref):
    # w_ref:   (t_cout, t_cin)          weight tile
    # x_ref:   (b_tile, t_cin, t_hw)    input tile (lane axis = H*W)
    # o_ref:   (b_tile, t_cout, t_hw)   output tile
    # acc_ref: (b_tile, t_cout, t_hw)   f32 accumulator scratch
    ci = pl.program_id(3)

    @pl.when(ci == 0)
    def _init():
        acc_ref[...] = jnp.zeros_like(acc_ref)

    w = w_ref[...]
    # Small static unroll over the batch tile; each slice is a plain 2-D MXU
    # matmul (t_cout, t_cin) @ (t_cin, t_hw) with f32 accumulation.
    for b in range(b_tile):
        acc_ref[b] += jnp.dot(w, x_ref[b], preferred_element_type=jnp.float32)

    @pl.when(ci == pl.num_programs(3) - 1)
    def _finalize():
        o_ref[...] = acc_ref[...].astype(o_ref.dtype)


# ------------------------- tiling heuristics -------------------------

def _choose_tiles(n, cin, cout, hw, itemsize):
    # --- Cout tile: bound weight + output VMEM; 256 aligns with v6e/v7x MXU.
    t_cout = cout if cout <= 256 else 256

    # --- Cin (reduction) tile: only when Cin is large AND cleanly divisible by
    #     128.  Exact division avoids ragged-reduction contamination (garbage
    #     OOB rows would otherwise be summed into valid outputs).
    t_cin = cin
    if cin > 1024 and cin % 128 == 0:
        for cand in (1024, 512, 256, 128):
            if cin % cand == 0:
                t_cin = cand
                break

    # --- Batch tile: amortize per-grid-step overhead when one batch element's
    #     input slab is small.
    slab = cin * hw * itemsize
    if slab >= (1 << 20):
        b_tile = 1
    else:
        b_tile = int(min(n, 8, max(1, (1 << 20) // max(slab, 1))))

    # --- Spatial (lane) tile from the explicit VMEM budget.
    w_bytes = 2 * t_cout * t_cin * itemsize               # double-buffered weight
    per_lane = (2 * b_tile * t_cin * itemsize             # double-buffered x
                + 2 * b_tile * t_cout * itemsize          # double-buffered out
                + b_tile * t_cout * 4)                    # f32 accumulator
    avail = max(_TILE_VMEM_BUDGET - w_bytes, 128 * per_lane)
    t_hw = min(2048, hw, avail // per_lane)
    if hw >= 128:
        t_hw = max(128, (t_hw // 128) * 128)              # lane-dense multiple of 128
    else:
        t_hw = hw                                         # full extent (allowed)

    # --- Guarantee a handful of parallel grid steps (v7x: 2 TensorCores/chip).
    def _steps(th):
        return (-(-n // b_tile)) * (-(-hw // th)) * (-(-cout // t_cout))

    while t_hw >= 256 and _steps(t_hw) < 4:
        t_hw = max(128, ((t_hw // 2) // 128) * 128)

    return b_tile, t_cin, t_cout, t_hw


# ------------------------- wrappers -------------------------

def _conv1x1_nchw3(w2d, x3):
    """y[n] = W @ x[n].  w2d: (Cout, Cin); x3: (N, Cin, HW) -> (N, Cout, HW)."""
    n, cin, hw = x3.shape
    cout = w2d.shape[0]
    itemsize = x3.dtype.itemsize
    b_tile, t_cin, t_cout, t_hw = _choose_tiles(n, cin, cout, hw, itemsize)

    grid = (pl.cdiv(n, b_tile), pl.cdiv(hw, t_hw),
            pl.cdiv(cout, t_cout), pl.cdiv(cin, t_cin))

    # Actual per-step VMEM footprint -> scoped-VMEM limit with headroom.
    footprint = (2 * t_cout * t_cin * itemsize
                 + 2 * b_tile * t_cin * t_hw * itemsize
                 + 2 * b_tile * t_cout * t_hw * itemsize
                 + b_tile * t_cout * t_hw * 4)
    vmem_limit = int(max(32 * 1024 * 1024, footprint + (4 << 20)))

    kernel = functools.partial(_conv1x1_kernel, b_tile)

    return pl.pallas_call(
        kernel,
        out_shape=jax.ShapeDtypeStruct((n, cout, hw), x3.dtype),
        grid=grid,
        in_specs=[
            # Weight tile: index only depends on (co, ci) -> not re-fetched
            # across consecutive steps when Cout/Cin are untiled.
            pl.BlockSpec((t_cout, t_cin), lambda b, s, co, ci: (co, ci)),
            # Input tile: per batch-block, per spatial tile, per Cin tile.
            pl.BlockSpec((b_tile, t_cin, t_hw), lambda b, s, co, ci: (b, ci, s)),
        ],
        out_specs=pl.BlockSpec((b_tile, t_cout, t_hw),
                               lambda b, s, co, ci: (b, co, s)),
        scratch_shapes=[pltpu.VMEM((b_tile, t_cout, t_hw), jnp.float32)],
        compiler_params=pltpu.CompilerParams(
            dimension_semantics=("parallel", "parallel", "parallel", "arbitrary"),
            vmem_limit_bytes=vmem_limit,
        ),
    )(w2d, x3)


def _conv1x1(x_nchw, weight):
    """1x1 conv, no bias.  x_nchw: (N, Cin, H, W); weight: (Cout, Cin, 1, 1)."""
    n, cin, h, w = x_nchw.shape
    cout = weight.shape[0]
    hw = h * w

    # NOTE: weight is cast to the input dtype (bf16 inputs -> bf16 weight) with
    # f32 accumulation in the MXU; adds weight-quantization error vs f32 conv.
    w2d = weight.reshape(cout, cin).astype(x_nchw.dtype)

    if hw < 128 and n > 1:
        # Small feature map: fold batch into the lane axis (one transpose each
        # way in the wrapper) so every kernel output store is lane-dense.
        x3 = jnp.transpose(x_nchw, (1, 0, 2, 3)).reshape(1, cin, n * hw)
        y3 = _conv1x1_nchw3(w2d, x3)                        # (1, Cout, N*HW)
        return jnp.transpose(y3.reshape(cout, n, h, w), (1, 0, 2, 3))

    # Free reshape: NCHW stays contiguous, H*W becomes the lane axis.
    x3 = x_nchw.reshape(n, cin, hw)
    y3 = _conv1x1_nchw3(w2d, x3)                            # (N, Cout, HW)
    return y3.reshape(n, cout, h, w)


class Identity:
    """JAX/Pallas port of the PyTorch `Identity` module."""

    def __init__(self, input_channel, output_channel, key=None):
        self.input_channel = input_channel
        self.output_channel = output_channel
        self.weight = None
        if input_channel != output_channel:
            if key is None:
                key = jax.random.PRNGKey(0)
            # Deterministic kaiming-uniform-like init for Conv2d(k=1) weight.
            fan_in = input_channel  # kernel_size = 1x1
            bound = (1.0 / fan_in) ** 0.5
            self.weight = jax.random.uniform(
                key, (output_channel, input_channel, 1, 1),
                minval=-bound, maxval=bound, dtype=jnp.float32,
            )

    def __call__(self, x):
        if self.weight is None:
            # Identity branch: semantic no-op, zero HBM traffic.
            return x
        return _conv1x1(x, self.weight)


# ------------------------- demo / self-check -------------------------

if __name__ == "__main__":
    key = jax.random.PRNGKey(0)
    kx, kw, kx2 = jax.random.split(key, 3)

    mod = Identity(input_channel=4, output_channel=8, key=kw)
    w2d = mod.weight.reshape(8, 4)

    # Case 1: Cin != Cout, H*W >= 128 -> direct NCHW lane-tiled path.
    x = jax.random.normal(kx, (2, 4, 16, 16), dtype=jnp.float32)  # NCHW
    y = jax.block_until_ready(mod(x))
    y_ref = jnp.einsum("oc,nchw->nohw", w2d, x)
    assert y.shape == (2, 8, 16, 16)
    assert jnp.allclose(y, y_ref, atol=1e-5, rtol=1e-5)

    # Case 2: small feature map (H*W < 128) -> batch folded into lane axis.
    x_small = jax.random.normal(kx2, (3, 4, 8, 8), dtype=jnp.float32)
    y_small = jax.block_until_ready(mod(x_small))
    y_small_ref = jnp.einsum("oc,nchw->nohw", w2d, x_small)
    assert y_small.shape == (3, 8, 8, 8)
    assert jnp.allclose(y_small, y_small_ref, atol=1e-5, rtol=1e-5)

    # Case 3: Cin == Cout -> identity (no data movement).
    mod_id = Identity(input_channel=4, output_channel=4)
    y_id = jax.block_until_ready(mod_id(x))
    assert y_id.shape == x.shape
    assert jnp.array_equal(y_id, x)

    print("KERNEL_OK")
</pallas_src>

<mosaic_0001>
module attributes {stable_mosaic.version = 11 : i64} {
  func.func @_conv1x1_kernel(%arg0: i32, %arg1: i32, %arg2: i32, %arg3: i32, %arg4: memref<8x4xf32, #tpu.memory_space<vmem>>, %arg5: memref<2x4x128xf32, #tpu.memory_space<vmem>>, %arg6: memref<2x8x128xf32, #tpu.memory_space<vmem>>, %arg7: memref<2x8x128xf32, #tpu.memory_space<vmem>>) attributes {dimension_semantics = [#tpu.dimension_semantics<parallel>, #tpu.dimension_semantics<parallel>, #tpu.dimension_semantics<parallel>, #tpu.dimension_semantics<arbitrary>], iteration_bounds = array<i64: 1, 2, 1, 1>, scalar_prefetch = 0 : i64, scratch_operands = 1 : i64, tpu.core_type = #tpu.core_type<tc>, window_params = [{transform_indices = @transform_0, window_bounds = array<i64: 8, 4>}, {transform_indices = @transform_1, window_bounds = array<i64: 2, 4, 128>}, {transform_indices = @transform_2, window_bounds = array<i64: 2, 8, 128>}]} {
    %c0_i32 = arith.constant 0 : i32
    %0 = arith.cmpi eq, %arg3, %c0_i32 : i32
    %1 = arith.extui %0 : i1 to i32
    %c0_i32_0 = arith.constant 0 : i32
    %2 = arith.cmpi ne, %1, %c0_i32_0 : i32
    scf.if %2 {
      %cst_22 = arith.constant 0.000000e+00 : f32
      %25 = vector.broadcast %cst_22 : f32 to vector<2x8x128xf32>
      %c0_23 = arith.constant 0 : index
      %c0_24 = arith.constant 0 : index
      %c0_25 = arith.constant 0 : index
      %26 = vector.load %arg7[%c0_23, %c0_24, %c0_25] : memref<2x8x128xf32, #tpu.memory_space<vmem>>, vector<2x8x128xf32>
      tpu.vector_store %arg7[%c0_23, %c0_24, %c0_25], %25 {strides = array<i32>} : memref<2x8x128xf32, #tpu.memory_space<vmem>>, vector<2x8x128xf32>,
    } else {
    }
    %c0 = arith.constant 0 : index
    %c0_1 = arith.constant 0 : index
    %3 = vector.load %arg4[%c0, %c0_1] : memref<8x4xf32, #tpu.memory_space<vmem>>, vector<8x4xf32>
    %c0_2 = arith.constant 0 : index
    %c0_3 = arith.constant 0 : index
    %c0_4 = arith.constant 0 : index
    %4 = vector.load %arg7[%c0_2, %c0_3, %c0_4] : memref<2x8x128xf32, #tpu.memory_space<vmem>>, vector<1x8x128xf32>
    %5 = vector.shape_cast %4 : vector<1x8x128xf32> to vector<8x128xf32>
    %c0_5 = arith.constant 0 : index
    %c0_6 = arith.constant 0 : index
    %c0_7 = arith.constant 0 : index
    %6 = vector.load %arg5[%c0_5, %c0_6, %c0_7] : memref<2x4x128xf32, #tpu.memory_space<vmem>>, vector<1x4x128xf32>
    %7 = vector.shape_cast %6 : vector<1x4x128xf32> to vector<4x128xf32>
    %cst = arith.constant dense<0.000000e+00> : vector<8x128xf32>
    %8 = tpu.matmul %3, %7, %cst {dimension_numbers = #tpu.dot_dimension_numbers<[1], [0], [0], [1], [0, 0, 1, 1], [], []>} : vector<8x4xf32>, vector<4x128xf32>, vector<8x128xf32> -> vector<8x128xf32>
    %9 = arith.addf %5, %8 : vector<8x128xf32>
    %c0_8 = arith.constant 0 : index
    %c0_9 = arith.constant 0 : index
    %c0_10 = arith.constant 0 : index
    %10 = vector.load %arg7[%c0_8, %c0_9, %c0_10] : memref<2x8x128xf32, #tpu.memory_space<vmem>>, vector<1x8x128xf32>
    %11 = vector.shape_cast %10 : vector<1x8x128xf32> to vector<8x128xf32>
    %12 = vector.shape_cast %9 : vector<8x128xf32> to vector<1x8x128xf32>
    tpu.vector_store %arg7[%c0_8, %c0_9, %c0_10], %12 {strides = array<i32>} : memref<2x8x128xf32, #tpu.memory_space<vmem>>, vector<1x8x128xf32>,
    %c1 = arith.constant 1 : index
    %c0_11 = arith.constant 0 : index
    %c0_12 = arith.constant 0 : index
    %13 = vector.load %arg7[%c1, %c0_11, %c0_12] : memref<2x8x128xf32, #tpu.memory_space<vmem>>, vector<1x8x128xf32>
    %14 = vector.shape_cast %13 : vector<1x8x128xf32> to vector<8x128xf32>
    %c1_13 = arith.constant 1 : index
    %c0_14 = arith.constant 0 : index
    %c0_15 = arith.constant 0 : index
    %15 = vector.load %arg5[%c1_13, %c0_14, %c0_15] : memref<2x4x128xf32, #tpu.memory_space<vmem>>, vector<1x4x128xf32>
    %16 = vector.shape_cast %15 : vector<1x4x128xf32> to vector<4x128xf32>
    %cst_16 = arith.constant dense<0.000000e+00> : vector<8x128xf32>
    %17 = tpu.matmul %3, %16, %cst_16 {dimension_numbers = #tpu.dot_dimension_numbers<[1], [0], [0], [1], [0, 0, 1, 1], [], []>} : vector<8x4xf32>, vector<4x128xf32>, vector<8x128xf32> -> vector<8x128xf32>
    %18 = arith.addf %14, %17 : vector<8x128xf32>
    %c1_17 = arith.constant 1 : index
    %c0_18 = arith.constant 0 : index
    %c0_19 = arith.constant 0 : index
    %19 = vector.load %arg7[%c1_17, %c0_18, %c0_19] : memref<2x8x128xf32, #tpu.memory_space<vmem>>, vector<1x8x128xf32>
    %20 = vector.shape_cast %19 : vector<1x8x128xf32> to vector<8x128xf32>
    %21 = vector.shape_cast %18 : vector<8x128xf32> to vector<1x8x128xf32>
    tpu.vector_store %arg7[%c1_17, %c0_18, %c0_19], %21 {strides = array<i32>} : memref<2x8x128xf32, #tpu.memory_space<vmem>>, vector<1x8x128xf32>,
    %c0_i32_20 = arith.constant 0 : i32
    %22 = arith.cmpi eq, %arg3, %c0_i32_20 : i32
    %23 = arith.extui %22 : i1 to i32
    %c0_i32_21 = arith.constant 0 : i32
    %24 = arith.cmpi ne, %23, %c0_i32_21 : i32
    scf.if %24 {
      %c0_22 = arith.constant 0 : index
      %c0_23 = arith.constant 0 : index
      %c0_24 = arith.constant 0 : index
      %25 = vector.load %arg7[%c0_22, %c0_23, %c0_24] : memref<2x8x128xf32, #tpu.memory_space<vmem>>, vector<2x8x128xf32>
      %c0_25 = arith.constant 0 : index
      %c0_26 = arith.constant 0 : index
      %c0_27 = arith.constant 0 : index
      %26 = vector.load %arg6[%c0_25, %c0_26, %c0_27] : memref<2x8x128xf32, #tpu.memory_space<vmem>>, vector<2x8x128xf32>
      tpu.vector_store %arg6[%c0_25, %c0_26, %c0_27], %25 {strides = array<i32>} : memref<2x8x128xf32, #tpu.memory_space<vmem>>, vector<2x8x128xf32>,
    } else {
    }
    return
  }
  func.func @transform_0(%arg0: i32, %arg1: i32, %arg2: i32, %arg3: i32) -> (i32, i32) {
    %c0_i32 = arith.constant 0 : i32
    return %arg2, %arg3 : i32, i32
  }
  func.func @transform_1(%arg0: i32, %arg1: i32, %arg2: i32, %arg3: i32) -> (i32, i32, i32) {
    %c0_i32 = arith.constant 0 : i32
    return %arg0, %arg3, %arg1 : i32, i32, i32
  }
  func.func @transform_2(%arg0: i32, %arg1: i32, %arg2: i32, %arg3: i32) -> (i32, i32, i32) {
    %c0_i32 = arith.constant 0 : i32
    return %arg0, %arg2, %arg1 : i32, i32, i32
  }
}

</mosaic_0001>

<bundles_post_ra>
// kernel: tpu_custom_call.1
= control target key start
LH: loop header
LB: loop body
LE: loop exit
PB: predicated region body
PF: predicated region fallthrough
CT: control target
= control target key end

     0   :  { %7 = vsyncpa [#allocation4], 0  ;;  %s955_s0 = inlined_call_operand.vmem [shape: f32[8,4], index: 0, kind: input, shape index: {}]   ;;  %s956_s1 = inlined_call_operand.hbm [shape: f32[2,4,256], index: 1, kind: input, shape index: {}]   ;;  %s957_s2 = inlined_call_operand.hbm [shape: f32[2,8,256], index: 2, kind: output, shape index: {}]  }
   0x1   :  { %9 = vsyncpa [#allocation4 + $0x1], 0 }
   0x2   :  { %10 = vsyncpa [#allocation5], 0 }
   0x3   :  { %12 = vsyncpa [#allocation5 + $0x1], 0  ;;  %s778_s9 = smov 0   ;;  %s780_s10 = smov 0  }
   0x4   :  { %s782_s11 = smov 0   ;;  %s784_s12 = smov 0  }
   0x5   :  { %s786_s13 = smov 0   ;;  %s788_s14 = smov 0  }
   0x6 LB: > { %s536_s15 = sadd.s32 4294967295, %s751_s14   ;;  %s537_s16 = sadd.s32 4294967294, %s751_s14   ;;  %s751_s14 = sphi %s788_s14, %s18_s14   ;;  %s747_s13 = sphi %s786_s13, %s971_s13   ;;  %s743_s12 = sphi %s784_s12, %s970_s12   ;;  %s739_s11 = sphi %s782_s11, %s969_s11   ;;  %s735_s10 = sphi %s780_s10, %s968_s10   ;;  %s731_s9 = sphi %s778_s9, %s967_s9  }
   0x7   : > { %s40_s17 = sadd.s32 1, %s747_s13  ;;  %s83_s18 = sadd.s32 1, %s739_s11 }
   0x8   : > { %p42_p0 = scmp.ge.s32.totalorder %s40_s17, 2  ;;  %p90_p1 = scmp.ne.s32.totalorder %s739_s11, %s735_s10 }
   0x9   : > { %p91_p2 = scmp.eq.s32.totalorder %s751_s14, 0  ;;  %p96_p3 = scmp.ne.s32.totalorder %s735_s10, %s731_s9 }
   0xa   : > { %s973_s17 = smov (%p42_p0, %s40_s17), 0  ;;  %p97_p5 = scmp.eq.s32.totalorder %s536_s15, 0 }
   0xb   : > { %p819_p4 = por %p91_p2, %p90_p1  ;;  %s79_s20 = ssub.s32 %s747_s13, %s973_s17 }
   0xc   : > { %p124_p6 = scmp.eq.s32.totalorder %s536_s15, 1  ;;  %p81_p7 = scmp.eq.s32.totalorder %s79_s20, 0 }
   0xd   : > { %p825_p8 = por %p97_p5, %p96_p3  ;;  %p130_p10 = scmp.eq.s32.totalorder %s537_s16, 1 }
   0xe   : > { %p829_p9 = por %p124_p6, %p90_p1  ;;  %p581_p13 = scmp.lt.s32.totalorder %s751_s14, 2 }
   0xf   : > { %s834_s23 = scalar_select %p81_p7, %s739_s11, %s83_s18  }
  0x10   : > { %s961_s22 = scalar_select %p829_p9, 1, 0 }
  0x11   : > { %p836_p11 = por %p130_p10, %p96_p3  ;;  %s160_s25 = sand.u32 1, %s739_s11  }
  0x12   : > { %s541_s26 = sshll.u32 %s160_s25, 3  ;;  %s542_s27 = sshll.u32 %s747_s13, 6 }
  0x13   : > { %s962_s24 = scalar_select %p836_p11, 1, 0 }
  0x14   : > { %s847_s30 = scalar_lea.hbm %s956_s1, %s542_s27  ;;  %s164_s3 = scalar_lea.vmem [#allocation3], %s541_s26 }
  0x15   : > { %s175_s4 = sshll.u32 %s164_s3, 4  ;;  %p853_p0 = pnand %p581_p13, %p819_p4  ;;  %s849_s4 = int_to_ptr.vmem [resolvable:$true] %s175_s4 }
  0x16   : > { %s857_s6 = scalar_lea.sflag [#allocation4], %s160_s25  ;;  %s639_s7 = scalar_lea.hbm %s847_s30, 128 }
  0x17   : > { %p640_p1 = scmp.ne.s32.totalorder %s847_s30, %s639_s7  ;;  %p641_p2 = pneg %p853_p0 }
  0x18   : > { %s644_s16 = scalar_lea.hbm %s956_s1, 256  ;;  %p645_p4 = scmp.lt.u32.totalorder %s847_s30, %s956_s1 }
  0x19   : > { %p642_p3 = pnand %p641_p2, %p640_p1  ;;  %p646_p6 = scmp.lt.u32.totalorder %s644_s16, %s639_s7 }
  0x1a   : > { %p648_p10 = scmp.lt.u32.totalorder %s639_s7, %s847_s30 }
  0x1b   : > { %p643_p5 = pneg %p642_p3  ;;  %p647_p7 = por %p646_p6, %p645_p4 }
  0x1d   : > { %p649_p13 = por %p648_p10, %p647_p7 }
  0x1f   : > { %p650_p12 = pnand %p649_p13, %p643_p5 }
  0x21   : > { %653 = shalt.err (!%p650_p12)
}
  0x22   : > { %s654_s20 = scalar_lea.vmem %s849_s4, 128  ;;  %s753_s25 = smov [#allocation3]  }
  0x23   : > { %p655_p1 = scmp.ne.s32.totalorder %s849_s4, %s654_s20  ;;  %s659_s26 = sshll.u32 %s753_s25, 4  ;;  %s660_s26 = int_to_ptr.vmem [resolvable:$false] %s659_s26 }
  0x24   : > { %s661_s27 = scalar_lea.vmem %s660_s26, 256  ;;  %p662_p9 = scmp.lt.s32.totalorder %s849_s4, %s660_s26 }
  0x25   : > { %p657_p3 = pnand %p655_p1, %p641_p2  ;;  %p663_p4 = scmp.lt.s32.totalorder %s661_s27, %s654_s20 }
  0x27   : > { %p658_p11 = pneg %p657_p3  ;;  %p664_p6 = por %p663_p4, %p662_p9 }
  0x29   : > { %p665_p7 = pnand %p664_p6, %p658_p11 }
  0x2b   : > { %668 = shalt.err (!%p665_p7)
}
  0x2c   : > { %s754_s28 = smov 128   ;;  %s755_s29 = smov 64  }
  0x2d   : > { %s756_s3 = smov 4   ;;  %p543_p12 = scmp.ge.s32.totalorder %s751_s14, 1 }
  0x2e   : > { %576 = dma.hbm_to_vmem [thread:$0]  (!%p853_p0), %s847_s30, 128, %s849_s4, %s857_s6, %s754_s28, %s755_s29, %s756_s3  }
  0x2f   : > { %p183_p2 = scmp.lt.s32.totalorder %s751_s14, 3 }
  0x31   : > { %p184_p5 = pnand %p543_p12, %p183_p2 }
  0x32   : > { %s888_s7 = sand.u32 (!%p184_p5), 1, %s735_s10  }
  0x33   : > { %187 = sbr.rel (%p184_p5) target bundleno = 291 (0x123), region = 28  ;;  %s544_s8 = sshll.u32 (!%p184_p5), %s888_s7, 3 }
  0x34   : > { %s190_s15 = scalar_lea.sflag (!%p184_p5), [#allocation4], %s888_s7  ;;  %s193_s16 = scalar_lea.vmem (!%p184_p5), [#allocation3], %s544_s8 }
  0x3a   : > { %722 = dma.done.wait (%p825_p8), %s190_s15, 128  }
  0x3b   : > { %724 = vsyncadd (%p825_p8), %s190_s15, 4294967168  ;;  %v757_v0 = vmov 0.0   ;;  %vm758_vm0 = vmmov 0   ;;  %vm243_vm1 = vcmask 1043456   ;;  %vm239_vm2 = vcmask 31744   ;;  %v236_v3 = vld [vmem:[%s955_s0] sm:$0xff] }
  0x3c   : > { %559 = vmatprep.subr.mxu0 %v757_v0  ;;  %564 = vmatprep.subr.mxu1 %v757_v0  ;;  %v238_v1 = vld [vmem:[%s193_s16] sm:$0xf]  ;;  %v548_v2 = vld [vmem:[%s193_s16 + $0x4] sm:$0xf]  ;;  %s545_s21 = sshll.u32 %s888_s7, 4  ;;  %s552_s18 = sshll.u32 %s743_s12, 7 }
  0x3d   : > { %561 = vmatprep.mubr.msk.f32.mxu0 %vm758_vm0, %v757_v0  ;;  %566 = vmatprep.mubr.msk.f32.mxu1 %vm758_vm0, %v757_v0  ;;  %s220_s5 = scalar_lea.vmem [#allocation6], %s545_s21  ;;  %s906_s25 = scalar_lea.hbm %s957_s2, %s552_s18 }
  0x3e   : > { %560 = vmatpush3.msk.msra.mxu0 %vm243_vm1, %v238_v1  ;;  %565 = vmatpush3.msk.msra.mxu1 %vm243_vm1, %v548_v2  ;;  %s423_s6 = sshll.u32 %s220_s5, 4  ;;  %s406_s26 = scalar_lea.sflag [#allocation5], %s888_s7  ;;  %s901_s6 = int_to_ptr.vmem [resolvable:$true] %s423_s6 }
  0x3f   : > { %562 = vmatmul.mubr.msk.f32.vlgmr.msra.gmra.mrb[0].mxu0 %vm239_vm2, %v236_v3  ;;  %567 = vmatmul.mubr.msk.f32.vlgmr.msra.gmra.mrb[0].mxu1 %vm239_vm2, %v236_v3  ;;  %s669_s27 = scalar_lea.vmem %s901_s6, 256  ;;  %p964_p9 = scmp.ne.s32.totalorder %s961_s22, 0 }
  0x40   : > { %p670_p8 = scmp.ne.s32.totalorder %s901_s6, %s669_s27  ;;  %s759_s12 = smov [#allocation6]  }
  0x41   : > { %s673_s28 = sshll.u32 %s759_s12, 4  ;;  %s674_s28 = int_to_ptr.vmem [resolvable:$false] %s673_s28 }
  0x42   : > { %p671_p11 = pnand %p670_p8, %p964_p9  ;;  %s675_s29 = scalar_lea.vmem %s674_s28, 512 }
  0x43   : > { %p676_p10 = scmp.lt.s32.totalorder %s901_s6, %s674_s28  ;;  %p677_p13 = scmp.lt.s32.totalorder %s675_s29, %s669_s27 }
  0x44   : > { %p672_p0 = pneg %p671_p11 }
  0x45   : > { %p678_p1 = por %p677_p13, %p676_p10 }
  0x47   : > { %p679_p3 = pnand %p678_p1, %p672_p0 }
 0x112   : > { %v313_v4 = vpop.f32.mrb[0].mxu0  ;;  %v392_v5 = vpop.f32.mrb[0].mxu1 }
 0x113   : > { %403 = vst [vmem:[%s220_s5] sm:$0xff] %v313_v4  ;;  %404 = vst [vmem:[%s220_s5 + $0x8] sm:$0xff] %v392_v5  ;;  %v563_v6 = vpop.f32.mrb[1].mxu0  ;;  %v568_v7 = vpop.f32.mrb[1].mxu1 }
 0x114   : > { %682 = shalt.err (!%p679_p3)
}
 0x115   : > { %s683_s3 = scalar_lea.hbm %s906_s25, 256  ;;  %s687_s16 = scalar_lea.hbm %s957_s2, 512 }
 0x116   : > { %p684_p4 = scmp.ne.s32.totalorder %s906_s25, %s683_s3  ;;  %p688_p12 = scmp.lt.u32.totalorder %s906_s25, %s957_s2 }
 0x117   : > { %p689_p2 = scmp.lt.u32.totalorder %s687_s16, %s683_s3  ;;  %p691_p8 = scmp.lt.u32.totalorder %s683_s3, %s906_s25 }
 0x118   : > { %p685_p6 = pnand %p684_p4, %p964_p9 }
 0x119   : > { %p690_p5 = por %p689_p2, %p688_p12 }
 0x11a   : > { %p686_p7 = pneg %p685_p6 }
 0x11b   : > { %p692_p11 = por %p691_p8, %p690_p5 }
 0x11d   : > { %p693_p0 = pnand %p692_p11, %p686_p7 }
 0x11f   : > { %696 = shalt.err (!%p693_p0)
}
 0x120   : > { %s760_s21 = smov 128   ;;  %s761_s5 = smov 256  }
 0x121   : > { %s762_s18 = smov 8  }
 0x122   : > { %571 = dma.vmem_to_hbm [thread:$0]  (%p964_p9), %s901_s6, 256, %s906_s25, %s406_s26, %s760_s21, %s761_s5, %s762_s18  }
 0x123 PF: > { %s438_s19 = sand.u32 1, %s731_s9   ;;  %p965_p10 = scmp.ne.s32.totalorder %s962_s24, 0 }
 0x124   : > { %p966_p13 = scmp.ge.s32.totalorder %s751_s14, 2  ;;  %s439_s20 = scalar_lea.sflag [#allocation5], %s438_s19 }
 0x126   : > { %p578_p1 = pnand %p966_p13, %p965_p10 }
 0x128   : > { %726 = dma.done.wait (!%p578_p1), %s439_s20, 256  }
 0x129   : > { %728 = vsyncadd (!%p578_p1), %s439_s20, 4294967040  ;;  %s18_s14 = sadd.s32 1, %s751_s14   ;;  %s967_s9 = smov %s735_s10 }
 0x12a   : > { %p15_p3 = scmp.ge.s32.totalorder %s18_s14, 4   ;;  %s968_s10 = smov %s739_s11 }
 0x12b   : > { %s969_s11 = smov %s834_s23  ;;  %s970_s12 = smov %s747_s13 }
 0x12c   : > { %s971_s13 = smov %s973_s17  ;;  %17 = sbr.rel (!%p15_p3) target bundleno = 6 (0x6), region = 86 }
 0x133   :  { %444 = vsyncpa [#allocation4], 1 }
 0x134   :  { %446 = vsyncpa [#allocation4 + $0x1], 1 }
 0x135   :  { %447 = vsyncpa [#allocation5], 1 }
 0x136   :  { %449 = vsyncpa [#allocation5 + $0x1], 1 }

</bundles_post_ra>
